<compile_context>
chip_gen: v5e
topology: v5e:2x2
jax: 0.10.0
libtpu: 0.0.40
codegen_flags: <defaults>
</compile_context>

<pallas_src>
import functools

import jax
import jax.numpy as jnp
from jax.experimental import pallas as pl
from jax.experimental.pallas import tpu as pltpu


def _entropy_rows_kernel(x_ref, h_ref, *, total_rows, tile_b):
    i = pl.program_id(0)

    x = x_ref[...]                                        # (tile_b, C), native dtype

    # Numerically-stable softmax statistics.  max/subtract stay in the input
    # dtype (bf16 on v6e/v7x halves VPU bytes); upcast once at the exp.
    m = jnp.max(x, axis=-1, keepdims=True)                # XLU row-max
    s = (x - m).astype(jnp.float32)                       # s <= 0 always
    e = jnp.exp(s)                                        # EUP

    # Lane reductions on the (otherwise idle) MXU instead of the XLU:
    #   denom = sum_c e,   num = sum_c e * s
    ones_c = jnp.ones((x.shape[-1], 1), jnp.float32)
    denom = jnp.dot(e, ones_c, preferred_element_type=jnp.float32)      # (tile_b, 1)
    num = jnp.dot(e * s, ones_c, preferred_element_type=jnp.float32)    # (tile_b, 1)

    # H_row = log(denom) - num / denom   (exact reciprocal: approx=True costs
    # ~1e-3 relative error, too coarse for the per-row entropy; the divide is
    # per-row only so it is negligible either way).
    h = jnp.log(denom) - num * pl.reciprocal(denom, approx=False)       # (tile_b, 1)

    # Only a per-row output mask: padded rows of the last tile produce finite
    # (or NaN) garbage that is discarded by this select; no full-tile input
    # mask is needed for the forward value.
    row = i * tile_b + jax.lax.broadcasted_iota(jnp.int32, (tile_b, 1), 0)
    h_ref[...] = jnp.where(row < total_rows, h, 0.0)


def _sublane_multiple(dtype):
    """Minimum sublane tile for the dtype: (8,128) f32, (16,128) bf16, (32,128) 8-bit."""
    bits = jnp.dtype(dtype).itemsize * 8
    if bits >= 32:
        return 8
    if bits == 16:
        return 16
    return 32


def _choose_tile_b(B, C, dtype, *, bytes_per_buffer=6 << 20):
    """Row-tile size.

    As many rows as fit the per-buffer byte budget (counted at f32 compute
    width so the in-kernel f32 temporaries are covered, keeping v7x's 64 MiB
    VMEM safe), rounded to the dtype's sublane multiple, and capped at
    ~ceil(B/2) so the grid has >= 2 steps for v7x megacore sharding.
    """
    align = _sublane_multiple(dtype)
    if B <= align:
        # Single full-array block: always a legal BlockSpec.
        return B
    # TODO(synk): for vocab-sized C (a single row of `align` sublanes exceeding
    # the VMEM budget) add a second "arbitrary" grid axis over C with an online
    # (streaming max / rescaled sums) entropy accumulation.
    rows_by_bytes = max(align, bytes_per_buffer // (C * 4))
    half_b = max(align, pl.cdiv(B, 2))          # keep >= 2 grid steps
    tile_b = min(B, rows_by_bytes, half_b)
    return max(align, (tile_b // align) * align)


def entropy_loss(x, *, tile_b=None):
    """Pallas implementation of EntropyLoss.forward for 2-D x of shape (B, C)."""
    B, C = x.shape
    if tile_b is None:
        tile_b = _choose_tile_b(B, C, x.dtype)
    num_tiles = pl.cdiv(B, tile_b)

    kernel = functools.partial(_entropy_rows_kernel, total_rows=B, tile_b=tile_b)

    per_row_entropy = pl.pallas_call(
        kernel,
        out_shape=jax.ShapeDtypeStruct((num_tiles * tile_b, 1), jnp.float32),
        grid_spec=pltpu.PrefetchScalarGridSpec(
            num_scalar_prefetch=0,
            grid=(num_tiles,),
            in_specs=[pl.BlockSpec((tile_b, C), lambda i: (i, 0))],
            # Each grid step owns its output block -> batch axis is parallel
            # (megacore sharding on v7x), no resident accumulator.
            out_specs=pl.BlockSpec((tile_b, 1), lambda i: (i, 0)),
        ),
        compiler_params=pltpu.CompilerParams(
            dimension_semantics=("parallel",),
            # Above the 16/32 MiB scoped defaults, with headroom under v7x's
            # 64 MiB physical VMEM per TC (v5e/v6e have 128 MiB physical).
            vmem_limit_bytes=48 * 1024 * 1024,
        ),
        cost_estimate=pl.CostEstimate(
            flops=6 * B * C,
            transcendentals=B * C,
            bytes_accessed=B * C * x.dtype.itemsize + num_tiles * tile_b * 4,
        ),
    )(x)

    # Final tiny reduce (padded rows were written as 0) + batch mean.
    return jnp.sum(per_row_entropy) / jnp.float32(B)


def entropy_loss_ref(x):
    """Pure-JAX reference matching the PyTorch module."""
    xf = x.astype(jnp.float32)
    p = jax.nn.softmax(xf, axis=1)
    logp = jax.nn.log_softmax(xf, axis=1)
    b = p * logp
    return -1.0 * jnp.mean(jnp.sum(b, axis=-1))


if __name__ == "__main__":
    # Main example: lane-dense class dim (C multiple of 128).  B=16 with the
    # auto tile (8 rows) exercises the >=2-grid-step (megacore) path.
    key = jax.random.PRNGKey(0)
    B, C = 16, 128
    x = jax.random.normal(key, (B, C), dtype=jnp.float32)

    out = jax.block_until_ready(entropy_loss(x))
    ref = entropy_loss_ref(x)
    assert jnp.allclose(out, ref, rtol=1e-4, atol=1e-5), (out, ref)

    # Ragged batch + non-128 C: last tile is padded; padded rows are masked
    # only on the output side inside the kernel.
    x2 = jax.random.normal(jax.random.PRNGKey(1), (20, 64), dtype=jnp.float32)
    out2 = jax.block_until_ready(entropy_loss(x2, tile_b=16))
    ref2 = entropy_loss_ref(x2)
    assert jnp.allclose(out2, ref2, rtol=1e-4, atol=1e-5), (out2, ref2)

    print("KERNEL_OK")
</pallas_src>

<mosaic_0001>
module attributes {stable_mosaic.version = 11 : i64} {
  func.func @_entropy_rows_kernel(%arg0: i32, %arg1: memref<8x128xf32, #tpu.memory_space<vmem>>, %arg2: memref<8x1xf32, #tpu.memory_space<vmem>>) attributes {dimension_semantics = [#tpu.dimension_semantics<parallel>], iteration_bounds = array<i64: 2>, scalar_prefetch = 0 : i64, scratch_operands = 0 : i64, tpu.core_type = #tpu.core_type<tc>, window_params = [{transform_indices = @transform_0, window_bounds = array<i64: 8, 128>}, {transform_indices = @transform_1, window_bounds = array<i64: 8, 1>}]} {
    %c0 = arith.constant 0 : index
    %c0_0 = arith.constant 0 : index
    %0 = vector.load %arg1[%c0, %c0_0] : memref<8x128xf32, #tpu.memory_space<vmem>>, vector<8x128xf32>
    %cst = arith.constant dense<0xFF800000> : vector<8xf32>
    %1 = vector.multi_reduction <maximumf>, %0, %cst [1] : vector<8x128xf32> to vector<8xf32>
    %2 = vector.shape_cast %1 : vector<8xf32> to vector<8x1xf32>
    %3 = vector.broadcast %2 : vector<8x1xf32> to vector<8x128xf32>
    %4 = arith.subf %0, %3 : vector<8x128xf32>
    %5 = math.exp %4 : vector<8x128xf32>
    %cst_1 = arith.constant 1.000000e+00 : f32
    %6 = vector.broadcast %cst_1 : f32 to vector<128x1xf32>
    %cst_2 = arith.constant dense<0.000000e+00> : vector<8x1xf32>
    %7 = tpu.matmul %5, %6, %cst_2 {dimension_numbers = #tpu.dot_dimension_numbers<[1], [0], [0], [1], [0, 0, 1, 1], [], []>} : vector<8x128xf32>, vector<128x1xf32>, vector<8x1xf32> -> vector<8x1xf32>
    %8 = arith.mulf %5, %4 : vector<8x128xf32>
    %cst_3 = arith.constant dense<0.000000e+00> : vector<8x1xf32>
    %9 = tpu.matmul %8, %6, %cst_3 {dimension_numbers = #tpu.dot_dimension_numbers<[1], [0], [0], [1], [0, 0, 1, 1], [], []>} : vector<8x128xf32>, vector<128x1xf32>, vector<8x1xf32> -> vector<8x1xf32>
    %10 = math.log %7 : vector<8x1xf32>
    %11 = tpu.reciprocal %7 : vector<8x1xf32> -> vector<8x1xf32>
    %12 = arith.mulf %9, %11 : vector<8x1xf32>
    %13 = arith.subf %10, %12 : vector<8x1xf32>
    %c8_i32 = arith.constant 8 : i32
    %14 = arith.muli %arg0, %c8_i32 : i32
    %15 = tpu.iota {dimensions = array<i32: 0>} : vector<8x1xi32>
    %16 = vector.broadcast %14 : i32 to vector<8x1xi32>
    %17 = arith.addi %16, %15 : vector<8x1xi32>
    %c16_i32 = arith.constant 16 : i32
    %18 = vector.broadcast %c16_i32 : i32 to vector<8x1xi32>
    %19 = arith.cmpi slt, %17, %18 : vector<8x1xi32>
    %cst_4 = arith.constant 0.000000e+00 : f32
    %20 = vector.broadcast %cst_4 : f32 to vector<8x1xf32>
    %21 = arith.select %19, %13, %20 : vector<8x1xi1>, vector<8x1xf32>
    %c0_5 = arith.constant 0 : index
    %c0_6 = arith.constant 0 : index
    %22 = vector.load %arg2[%c0_5, %c0_6] : memref<8x1xf32, #tpu.memory_space<vmem>>, vector<8x1xf32>
    tpu.vector_store %arg2[%c0_5, %c0_6], %21 {strides = array<i32>} : memref<8x1xf32, #tpu.memory_space<vmem>>, vector<8x1xf32>,
    return
  }
  func.func @transform_0(%arg0: i32) -> (i32, i32) {
    %c0_i32 = arith.constant 0 : i32
    %c0_i32_0 = arith.constant 0 : i32
    return %arg0, %c0_i32 : i32, i32
  }
  func.func @transform_1(%arg0: i32) -> (i32, i32) {
    %c0_i32 = arith.constant 0 : i32
    %c0_i32_0 = arith.constant 0 : i32
    return %arg0, %c0_i32 : i32, i32
  }
}

</mosaic_0001>

<bundles_post_ra>
// kernel: tpu_custom_call.1
= control target key start
LH: loop header
LB: loop body
LE: loop exit
PB: predicated region body
PF: predicated region fallthrough
CT: control target
= control target key end

     0   :  { %6 = vsyncpa [#allocation3], 0  ;;  %s502_s0 = inlined_call_operand.hbm [shape: f32[16,128], index: 0, kind: input, shape index: {}]   ;;  %s503_s1 = inlined_call_operand.vmem [shape: f32[16,1], index: 1, kind: output, shape index: {}]  }
   0x1   :  { %8 = vsyncpa [#allocation3 + $0x1], 0  ;;  %s407_s6 = smov 0   ;;  %s409_s7 = smov 0  }
   0x2   :  { %s411_s8 = smov 0   ;;  %s413_s9 = smov 0  }
   0x3 LB: > { %s426_s10 = sadd.s32 4294967295, %s394_s9   ;;  %s429_s11 = sadd.s32 1, %s394_s9   ;;  %s394_s9 = sphi %s413_s9, %s510_s9   ;;  %s390_s8 = sphi %s411_s8, %s509_s8   ;;  %s386_s7 = sphi %s409_s7, %s508_s7   ;;  %s382_s6 = sphi %s407_s6, %s507_s6  }
   0x4   : > { %s18_s12 = ssub.s32 %s394_s9, %s429_s11  ;;  %s21_s13 = sadd.s32 1, %s390_s8 }
   0x5   : > { %p19_p0 = scmp.eq.s32.totalorder %s18_s12, 0  ;;  %p28_p1 = scmp.ne.s32.totalorder %s390_s8, %s386_s7 }
   0x6   : > { %p29_p2 = scmp.eq.s32.totalorder %s394_s9, 0  ;;  %p34_p3 = scmp.ne.s32.totalorder %s386_s7, %s382_s6 }
   0x7   : > { %s439_s14 = scalar_select %p19_p0, %s390_s8, %s21_s13  }
   0x8   : > { %p441_p4 = por %p29_p2, %p28_p1  ;;  %p35_p5 = scmp.eq.s32.totalorder %s426_s10, 0 }
   0x9   : > { %p290_p6 = scmp.lt.s32.totalorder %s394_s9, 2  ;;  %s84_s17 = sand.u32 1, %s390_s8  }
   0xa   : > { %p447_p7 = por %p35_p5, %p34_p3  ;;  %s276_s18 = sshll.u32 %s84_s17, 3 }
   0xb   : > { %s277_s19 = sshll.u32 %s394_s9, 3  ;;  %s88_s23 = scalar_lea.vmem [#allocation2], %s276_s18 }
   0xc   : > { %s92_s22 = scalar_lea.hbm %s502_s0, %s277_s19  ;;  %s96_s24 = sshll.u32 %s88_s23, 4  ;;  %s97_s24 = int_to_ptr.vmem [resolvable:$true] %s96_s24 }
   0xd   : > { %s94_s25 = sshll.u32 %s92_s22, 4  ;;  %p458_p8 = pnand %p290_p6, %p441_p4  ;;  %s95_s25 = int_to_ptr.hbm [resolvable:$true] %s94_s25 }
   0xe   : > { %p278_p9 = scmp.ge.s32.totalorder %s394_s9, 1  ;;  %p101_p10 = scmp.lt.s32.totalorder %s394_s9, 3 }
   0xf   : > { %s85_s27 = scalar_lea.sflag [#allocation3], %s84_s17  ;;  %s330_s28 = sshra.s32 %s95_s25, 4  ;;  %s331_s28 = int_to_ptr.hbm [resolvable:$true] %s330_s28 }
  0x10   : > { %s332_s29 = scalar_lea.hbm %s331_s28, 8  ;;  %p334_p12 = pneg %p458_p8 }
  0x11   : > { %p333_p11 = scmp.ne.s32.totalorder %s331_s28, %s332_s29  ;;  %s337_s3 = scalar_lea.hbm %s502_s0, 16 }
  0x12   : > { %p338_p1 = scmp.lt.s32.totalorder %s331_s28, %s502_s0  ;;  %p339_p2 = scmp.lt.s32.totalorder %s337_s3, %s332_s29 }
  0x13   : > { %p335_p13 = pnand %p334_p12, %p333_p11 }
  0x14   : > { %p340_p3 = por %p339_p2, %p338_p1 }
  0x15   : > { %p336_p0 = pneg %p335_p13 }
  0x17   : > { %p341_p4 = pnand %p340_p3, %p336_p0 }
  0x19   : > { %344 = shalt.err (!%p341_p4)
}
  0x1a   : > { %289 = dma.hbm_to_vmem [thread:$0]  (!%p458_p8), %s95_s25, 128, %s97_s24, %s85_s27  }
  0x1b   : > { %p102_p5 = pnand %p278_p9, %p101_p10 }
  0x1c   : > { %s107_s6 = sand.u32 (!%p102_p5), 1, %s386_s7  }
  0x1d   : > { %105 = sbr.rel (%p102_p5) target bundleno = 313 (0x139), region = 24  ;;  %s279_s12 = sshll.u32 (!%p102_p5), %s107_s6, 3 }
  0x1e   : > { %s108_s13 = scalar_lea.sflag (!%p102_p5), [#allocation3], %s107_s6  ;;  %s111_s15 = scalar_lea.vmem (!%p102_p5), [#allocation2], %s279_s12 }
  0x22   : > { %377 = dma.done.wait (%p447_p7), %s108_s13, 128  }
  0x23   : > { %379 = vsyncadd (%p447_p7), %s108_s13, 4294967168  ;;  %v396_v0 = vmov 1.0   ;;  %v134_v1 = vld [vmem:[%s111_s15] sm:$0xff]  ;;  %v200_v9 = vlaneseq  ;;  %p130_p6 = scmp.lt.s32.totalorder %s426_s10, 1  ;;  %s281_s9 = sshll.u32 %s426_s10, 3  ;;  %vm206_vm5 = vcmask 7168  }
  0x24   : > { %140 = vmatpush.msra.mxu0 %v396_v0  ;;  %161 = vmatpush.msra.mxu1 %v396_v0  ;;  %v202_v16 = vstv %s281_s9 }
  0x25   : > { %135 = vmax.xlane.f32.xlu0 %v134_v1  ;;  %v201_v13 = vshrl.u32 %v200_v9, 7  ;;  %s512_s10 = smov (!%p130_p6, %s426_s10), 1 }
  0x26   : > { %141 = vmatpush.msra.mxu0 %v396_v0  ;;  %162 = vmatpush.msra.mxu1 %v396_v0  ;;  %s280_s16 = sshll.u32 %s512_s10, 3 }
  0x27   : > { %v203_v20 = vadd.s32 %v202_v16, %v201_v13  ;;  %s133_s19 = scalar_lea.vmem %s503_s1, %s280_s16 }
  0x28   : > { %142 = vmatpush.msra.mxu0 %v396_v0  ;;  %163 = vmatpush.msra.mxu1 %v396_v0 }
  0x29   : > { %vm204_vm4 = vcmp.lt.s32.totalorder %v203_v20, 16 }
  0x2a   : > { %143 = vmatpush.msra.mxu0 %v396_v0  ;;  %164 = vmatpush.msra.mxu1 %v396_v0 }
  0x2c   : > { %144 = vmatpush.msra.mxu0 %v396_v0  ;;  %165 = vmatpush.msra.mxu1 %v396_v0 }
  0x2e   : > { %145 = vmatpush.msra.mxu0 %v396_v0  ;;  %166 = vmatpush.msra.mxu1 %v396_v0 }
  0x30   : > { %146 = vmatpush.msra.mxu0 %v396_v0  ;;  %167 = vmatpush.msra.mxu1 %v396_v0 }
  0x32   : > { %147 = vmatpush.msra.mxu0 %v396_v0  ;;  %168 = vmatpush.msra.mxu1 %v396_v0 }
  0x34   : > { %148 = vmatpush.msra.mxu0 %v396_v0  ;;  %169 = vmatpush.msra.mxu1 %v396_v0 }
  0x36   : > { %149 = vmatpush.msra.mxu0 %v396_v0  ;;  %170 = vmatpush.msra.mxu1 %v396_v0 }
  0x38   : > { %150 = vmatpush.msra.mxu0 %v396_v0  ;;  %171 = vmatpush.msra.mxu1 %v396_v0 }
  0x3a   : > { %151 = vmatpush.msra.mxu0 %v396_v0  ;;  %172 = vmatpush.msra.mxu1 %v396_v0 }
  0x3c   : > { %152 = vmatpush.msra.mxu0 %v396_v0  ;;  %173 = vmatpush.msra.mxu1 %v396_v0 }
  0x3e   : > { %153 = vmatpush.msra.mxu0 %v396_v0  ;;  %174 = vmatpush.msra.mxu1 %v396_v0 }
  0x40   : > { %154 = vmatpush.msra.mxu0 %v396_v0  ;;  %175 = vmatpush.msra.mxu1 %v396_v0 }
  0x42   : > { %155 = vmatpush.msra.mxu0 %v396_v0  ;;  %176 = vmatpush.msra.mxu1 %v396_v0 }
  0x98   : > { %v136_v2 = vpop.xlane.xlu0 %135 }
  0x99   : > { %v137_v3 = vsub.f32 %v134_v1, %v136_v2 }
  0x9b   : > { %v138_v4 = vmul.f32 1.442695, %v137_v3 }
  0x9d   : > { %324 = vpow2.f32 %v138_v4 }
  0xa3   : > { %v325_v5 = vpop.eup %324 }
  0xa4   : > { %156 = vmatmul.f32.vlgmr.msra.gmra.mxu0 %v325_v5  ;;  %v160_v6 = vmul.f32 %v325_v5, %v137_v3 }
  0xa6   : > { %177 = vmatmul.f32.vlgmr.msra.gmra.mxu1 %v160_v6 }
 0x121   : > { %v157_v7 = vpop.f32.mrf.mxu0 }
 0x122   : > { %326 = vrcp.f32 %v157_v7  ;;  %v194_v12 = vand.u32 2147483648, %v157_v7  ;;  %v192_v15 = vand.u32 2147483647, %v157_v7  ;;  %vm188_vm1 = vweird.f32 %v157_v7 }
 0x123   : > { %328 = vlog2.f32 %v157_v7  ;;  %v178_v22 = vpop.f32.mrf.mxu1 }
 0x124   : > { %v195_v19 = vor.u32 1.1754944e-38, %v194_v12  ;;  %vm193_vm3 = vcmp.eq.f32.partialorder %v192_v15, 8.507059e+37 }
 0x128   : > { %v327_v8 = vpop.eup %326 }
 0x129   : > { %v184_v10 = vmul.f32 %v327_v8, %v157_v7  ;;  %vm189_vm0 = vweird.f32 %v327_v8  ;;  %v329_v18 = vpop.eup %328 }
 0x12a   : > { %vm190_vm2 = vmor %vm188_vm1, %vm189_vm0  ;;  %v182_v24 = vmul.f32 0.6931472, %v329_v18 }
 0x12b   : > { %v185_v11 = vsub.f32 1.0, %v184_v10 }
 0x12d   : > { %v186_v14 = vmul.f32 %v327_v8, %v185_v11 }
 0x12f   : > { %v187_v17 = vadd.f32 %v327_v8, %v186_v14 }
 0x131   : > { %v191_v21 = vsel %vm190_vm2, %v327_v8, %v187_v17 }
 0x132   : > { %v196_v23 = vsel %vm193_vm3, %v195_v19, %v191_v21 }
 0x133   : > { %v197_v25 = vmul.f32 %v196_v23, %v178_v22 }
 0x135   : > { %v198_v26 = vsub.f32 %v182_v24, %v197_v25 }
 0x137   : > { %v205_v27 = vsel %vm204_vm4, %v198_v26, 0.0 }
 0x138   : > { %207 = vst.msk [vmem:[%s133_s19] sm:$0xff] %vm206_vm5, %v205_v27 }
 0x139 PF: > { %p11_p7 = scmp.ge.s32.totalorder %s429_s11, 4   ;;  %s507_s6 = smov %s386_s7 }
 0x13a   : > { %s508_s7 = smov %s390_s8  ;;  %s509_s8 = smov %s439_s14 }
 0x13b   : > { %s510_s9 = smov %s429_s11  ;;  %13 = sbr.rel (!%p11_p7) target bundleno = 3 (0x3), region = 64 }
 0x140   :  { %227 = vsyncpa [#allocation3], 1 }
 0x141   :  { %229 = vsyncpa [#allocation3 + $0x1], 1 }

</bundles_post_ra>
